<compile_context>
chip_gen: v7x
topology: tpu7x:2x2x1
jax: 0.10.0
libtpu: 0.0.40
codegen_flags: <defaults>
</compile_context>

<pallas_src>
import math
import functools

import jax
import jax.numpy as jnp
from jax import lax
from jax.experimental import pallas as pl
from jax.experimental.pallas import tpu as pltpu


def _round_up(a, b):
    return ((a + b - 1) // b) * b


def _gelu(h, approximate):
    if approximate:
        # tanh-approx GELU: transcendental runs on the EUP slot (useful once the
        # kernel is compute-bound).  Not the torch.nn.GELU() default.
        return jax.nn.gelu(h, approximate=True)
    # Exact erf GELU -- matches torch.nn.GELU() default.
    return 0.5 * h * (1.0 + lax.erf(h * (1.0 / math.sqrt(2.0))))


def _layernorm(x_f32, g_ref, bt_ref, eps):
    mean = jnp.mean(x_f32, axis=-1, keepdims=True)
    xc = x_f32 - mean
    var = jnp.mean(xc * xc, axis=-1, keepdims=True)
    xn = xc * lax.rsqrt(var + eps)
    return xn * g_ref[...].astype(jnp.float32) + bt_ref[...].astype(jnp.float32)


def _ffn_kernel_fused(x_ref, g_ref, bt_ref, w1_ref, b1_ref, w2_ref, b2_ref, o_ref,
                      *, eps, compute_dtype, approx_gelu):
    """Whole hidden dim resident (nk == 1): LN -> matmul -> GELU -> matmul, no scratch."""
    xn = _layernorm(x_ref[...].astype(jnp.float32), g_ref, bt_ref, eps)
    h = jnp.dot(xn.astype(compute_dtype), w1_ref[...],
                preferred_element_type=jnp.float32)
    h = _gelu(h + b1_ref[...].astype(jnp.float32), approx_gelu)
    y = jnp.dot(h.astype(compute_dtype), w2_ref[...],
                preferred_element_type=jnp.float32)
    o_ref[...] = (y + b2_ref[...].astype(jnp.float32)).astype(o_ref.dtype)


def _ffn_kernel_split(x_ref, g_ref, bt_ref, w1_ref, b1_ref, w2_ref, b2_ref, o_ref,
                      xn_ref, acc_ref, *, eps, compute_dtype, approx_gelu):
    """Hidden dim tiled over grid axis 1; second matmul accumulated in f32 scratch."""
    k = pl.program_id(1)

    @pl.when(k == 0)
    def _():
        # LayerNorm once per row tile, cached for the remaining hidden slices.
        xn = _layernorm(x_ref[...].astype(jnp.float32), g_ref, bt_ref, eps)
        xn_ref[...] = xn.astype(compute_dtype)

    h = jnp.dot(xn_ref[...], w1_ref[...], preferred_element_type=jnp.float32)
    h = _gelu(h + b1_ref[...].astype(jnp.float32), approx_gelu)
    p = jnp.dot(h.astype(compute_dtype), w2_ref[...],
                preferred_element_type=jnp.float32)

    @pl.when(k == 0)
    def _():
        acc_ref[...] = p            # init with first partial product (no zeros store)

    @pl.when(k > 0)
    def _():
        acc_ref[...] += p

    @pl.when(k == pl.num_programs(1) - 1)
    def _():
        o_ref[...] = (acc_ref[...] + b2_ref[...].astype(jnp.float32)).astype(o_ref.dtype)


def _pick_hidden_tile(hidden, block_hidden):
    """Largest multiple-of-256 (preferred; MXU is 256-wide on v6e/v7x), else
    multiple-of-128, divisor of `hidden` that is <= block_hidden.  None if none."""
    cap = min(block_hidden, hidden)
    for step in (256, 128):
        t = (cap // step) * step
        while t >= step:
            if hidden % t == 0:
                return t
            t -= step
    return None


def _tile_footprint(tm, th, dim, nk, x_itemsize, o_itemsize, w_itemsize):
    """Approximate VMEM bytes for one pipelined grid step (double-buffered tiles)."""
    fp = 2 * tm * dim * x_itemsize                 # x row tile
    fp += 2 * tm * dim * o_itemsize                # out row tile
    fp += 2 * 2 * dim * th * w_itemsize            # W1 + W2 slices
    fp += 2 * (th + 3 * dim) * 4                   # b1 slice, b2, gamma, beta (f32)
    fp += 2 * tm * th * 4                          # (tm, th) f32 matmul1/GELU live values
    if nk > 1:
        fp += tm * dim * w_itemsize                # LN cache scratch
        fp += tm * dim * 4                         # f32 accumulator scratch
    return fp


def feed_forward(x, params, *, eps=1e-5, tile_rows=None, block_hidden=512,
                 compute_dtype=jnp.bfloat16, weights_resident=None,
                 cast_input=False, approx_gelu=False):
    """x: (..., dim) -> (..., dim). LN + Linear + GELU + Linear fused in one Pallas kernel.

    weights_resident: None = auto (resident iff the full W1/W2 fit ~half of VMEM);
                      True/False force the resident / hidden-tiled path.
    cast_input:       cast x to compute_dtype before the call (VMEM/HBM trim, e.g. v7x).
    approx_gelu:      tanh-approx GELU (EUP) instead of exact erf (torch default).
    """
    gamma, beta, w1, b1, w2, b2 = params
    dim = x.shape[-1]
    hidden = w1.shape[1]
    orig_shape = x.shape

    xf = x.reshape(-1, dim)
    if cast_input:
        xf = xf.astype(compute_dtype)
    n = xf.shape[0]

    try:
        phys_vmem = int(pltpu.get_tpu_info().vmem_capacity_bytes)
    except Exception:
        phys_vmem = 64 * 1024 * 1024              # conservative (v7x per-TC VMEM)
    budget = int(phys_vmem * 0.85)

    w_itemsize = jnp.dtype(compute_dtype).itemsize
    x_itemsize = jnp.dtype(xf.dtype).itemsize
    o_itemsize = jnp.dtype(x.dtype).itemsize

    # ---- hidden tiling: keep weights grid-resident (DMA'd once) when they fit ----
    block_hidden = max(int(block_hidden), 128)
    if weights_resident is None:
        # 2 matrices x 2 pipeline buffers x dim*hidden*itemsize must fit ~half of VMEM.
        weights_resident = (2 * 2 * dim * hidden * w_itemsize) <= int(phys_vmem * 0.5)

    hidden_pad = hidden
    if weights_resident:
        th = hidden
    else:
        th = _pick_hidden_tile(hidden, block_hidden)
        if th is None:
            # Non-128-divisible hidden: zero-pad the hidden axis.  Exact, since
            # GELU(0 + 0) == 0 and the padded W2 rows are zero.
            hidden_pad = _round_up(hidden, 128)
            th = _pick_hidden_tile(hidden_pad, block_hidden)
    nk = hidden_pad // th

    # Matmul operands in compute_dtype (bf16 default, f32 MXU accumulation);
    # LN / GELU / bias math stays f32.
    w1c = w1.astype(compute_dtype)
    w2c = w2.astype(compute_dtype)
    g2 = gamma.reshape(1, dim).astype(jnp.float32)
    bt2 = beta.reshape(1, dim).astype(jnp.float32)
    b1_2 = b1.reshape(1, hidden).astype(jnp.float32)
    b2_2 = b2.reshape(1, dim).astype(jnp.float32)
    if hidden_pad != hidden:
        ph = hidden_pad - hidden
        w1c = jnp.pad(w1c, ((0, 0), (0, ph)))
        b1_2 = jnp.pad(b1_2, ((0, 0), (0, ph)))
        w2c = jnp.pad(w2c, ((0, ph), (0, 0)))

    # ---- row tiling ----
    row_align = 16 if w_itemsize < 4 else 8       # bf16 sublane packing (v5e note)
    if tile_rows is None:
        # Roofline-ish row tile: big on 128-MiB-VMEM parts (v5e/v6e), trimmed for
        # v7x's 64 MiB per-TC VMEM.  The footprint loop below shrinks it if needed.
        tile_rows = 1024 if phys_vmem >= (100 << 20) else 512
    tm = max(row_align,
             _round_up(min(int(tile_rows), _round_up(n, row_align)), row_align))
    # Guarantee >= 2 row tiles when there is enough work so the "parallel" axis can
    # shard across both TensorCores on v7x.
    if n > 2 * row_align:
        tm = min(tm, max(row_align, _round_up(-(-n // 2), row_align)))
    # Shrink the row tile until the pipeline footprint fits VMEM.
    while tm > row_align and _tile_footprint(tm, th, dim, nk, x_itemsize,
                                             o_itemsize, w_itemsize) > budget:
        tm = max(row_align, _round_up(tm // 2, row_align))

    grid = (pl.cdiv(n, tm), nk)                   # ragged N -> partial edge blocks

    if nk == 1:
        kernel = functools.partial(_ffn_kernel_fused, eps=eps,
                                   compute_dtype=compute_dtype,
                                   approx_gelu=approx_gelu)
        scratch_shapes = []
    else:
        kernel = functools.partial(_ffn_kernel_split, eps=eps,
                                   compute_dtype=compute_dtype,
                                   approx_gelu=approx_gelu)
        scratch_shapes = [pltpu.VMEM((tm, dim), compute_dtype),   # cached LN output
                          pltpu.VMEM((tm, dim), jnp.float32)]     # f32 accumulator

    # TODO(synk): pipeline_mode=pl.Buffered(1) on the grid-invariant weight/bias specs
    # would drop their second pipeline buffer; omitted for version portability (they
    # are still DMA'd only once per kernel since their block index never changes).
    out = pl.pallas_call(
        kernel,
        out_shape=jax.ShapeDtypeStruct((n, dim), x.dtype),
        grid_spec=pltpu.PrefetchScalarGridSpec(
            num_scalar_prefetch=0,
            grid=grid,
            in_specs=[
                pl.BlockSpec((tm, dim), lambda i, k: (i, 0)),     # x row tile
                pl.BlockSpec((1, dim), lambda i, k: (0, 0)),      # gamma
                pl.BlockSpec((1, dim), lambda i, k: (0, 0)),      # beta
                pl.BlockSpec((dim, th), lambda i, k: (0, k)),     # W1 column slice
                pl.BlockSpec((1, th), lambda i, k: (0, k)),       # b1 slice
                pl.BlockSpec((th, dim), lambda i, k: (k, 0)),     # W2 row slice
                pl.BlockSpec((1, dim), lambda i, k: (0, 0)),      # b2
            ],
            out_specs=pl.BlockSpec((tm, dim), lambda i, k: (i, 0)),
            scratch_shapes=scratch_shapes,
        ),
        compiler_params=pltpu.CompilerParams(
            dimension_semantics=("parallel", "arbitrary"),
            vmem_limit_bytes=int(phys_vmem * 0.9),
        ),
    )(xf, g2, bt2, w1c, b1_2, w2c, b2_2)

    return out.reshape(orig_shape)


def init_params(key, dim, hidden_dim, dtype=jnp.float32):
    """PyTorch-default init. LayerNorm: gamma=1, beta=0.
       Linear: W, b ~ U(-1/sqrt(fan_in), 1/sqrt(fan_in)).
       Weights stored transposed: (in_features, out_features)."""
    k1, k2, k3, k4 = jax.random.split(key, 4)
    gamma = jnp.ones((dim,), dtype)
    beta = jnp.zeros((dim,), dtype)
    bound1 = 1.0 / math.sqrt(dim)
    w1 = jax.random.uniform(k1, (dim, hidden_dim), dtype, -bound1, bound1)
    b1 = jax.random.uniform(k2, (hidden_dim,), dtype, -bound1, bound1)
    bound2 = 1.0 / math.sqrt(hidden_dim)
    w2 = jax.random.uniform(k3, (hidden_dim, dim), dtype, -bound2, bound2)
    b2 = jax.random.uniform(k4, (dim,), dtype, -bound2, bound2)
    return (gamma, beta, w1, b1, w2, b2)


def feed_forward_reference(x, params, eps=1e-5):
    gamma, beta, w1, b1, w2, b2 = params
    xf = x.astype(jnp.float32)
    mean = jnp.mean(xf, axis=-1, keepdims=True)
    var = jnp.mean((xf - mean) ** 2, axis=-1, keepdims=True)
    xn = (xf - mean) / jnp.sqrt(var + eps) * gamma + beta
    h = xn @ w1 + b1
    h = 0.5 * h * (1.0 + lax.erf(h / math.sqrt(2.0)))
    y = h @ w2 + b2
    return y.astype(x.dtype)


if __name__ == "__main__":
    key = jax.random.PRNGKey(0)
    k_x, k_p, k_p2 = jax.random.split(key, 3)

    # Small, lane-friendly shapes; seq=7 (n=14 rows) exercises the partial-edge-block
    # (masked write) path that replaced the old pad/slice.
    batch, seq, dim, hidden = 2, 7, 128, 256
    x = jax.random.normal(k_x, (batch, seq, dim), jnp.float32)
    params = init_params(k_p, dim, hidden)
    ref = feed_forward_reference(x, params)

    # 1) f32-operand, forced hidden-tiled path (th=128, nk=2): validates the
    #    accumulation grid, first-partial-product accumulator init, ragged rows.
    out_f32 = jax.block_until_ready(
        feed_forward(x, params, compute_dtype=jnp.float32,
                     weights_resident=False, block_hidden=128))
    assert out_f32.shape == x.shape and out_f32.dtype == x.dtype
    assert jnp.allclose(out_f32, ref, atol=1e-4, rtol=1e-4), "f32 split mismatch"

    # 2) Default path: bf16 operands, weights grid-resident (nk=1, fused kernel).
    out_bf16 = jax.block_until_ready(feed_forward(x, params))
    assert out_bf16.shape == x.shape and out_bf16.dtype == x.dtype
    assert jnp.allclose(out_bf16, ref, atol=3e-2, rtol=3e-2), "bf16 fused mismatch"

    # 3) Non-128-divisible hidden (192) with forced tiling: exercises the exact
    #    zero-padded hidden-axis fallback (replaces the old th=hidden blow-up).
    params2 = init_params(k_p2, dim, 192)
    ref2 = feed_forward_reference(x, params2)
    out2 = jax.block_until_ready(
        feed_forward(x, params2, compute_dtype=jnp.float32,
                     weights_resident=False, block_hidden=128))
    assert jnp.allclose(out2, ref2, atol=1e-4, rtol=1e-4), "padded-hidden mismatch"

    # 4) bf16 input-cast path (VMEM/HBM trim used for v7x-sized row tiles).
    out_cast = jax.block_until_ready(feed_forward(x, params, cast_input=True))
    assert jnp.allclose(out_cast, ref, atol=5e-2, rtol=5e-2), "cast-input mismatch"

    print("KERNEL_OK")
</pallas_src>

<mosaic_0001>
module attributes {stable_mosaic.version = 11 : i64} {
  func.func @_ffn_kernel_split(%arg0: i32, %arg1: i32, %arg2: memref<16x128xf32, #tpu.memory_space<vmem>>, %arg3: memref<1x128xf32, #tpu.memory_space<vmem>>, %arg4: memref<1x128xf32, #tpu.memory_space<vmem>>, %arg5: memref<128x128xf32, #tpu.memory_space<vmem>>, %arg6: memref<1x128xf32, #tpu.memory_space<vmem>>, %arg7: memref<128x128xf32, #tpu.memory_space<vmem>>, %arg8: memref<1x128xf32, #tpu.memory_space<vmem>>, %arg9: memref<16x128xf32, #tpu.memory_space<vmem>>, %arg10: memref<16x128xf32, #tpu.memory_space<vmem>>, %arg11: memref<16x128xf32, #tpu.memory_space<vmem>>) attributes {dimension_semantics = [#tpu.dimension_semantics<parallel>, #tpu.dimension_semantics<arbitrary>], iteration_bounds = array<i64: 1, 2>, scalar_prefetch = 0 : i64, scratch_operands = 2 : i64, tpu.core_type = #tpu.core_type<tc>, window_params = [{transform_indices = @transform_0, window_bounds = array<i64: 16, 128>}, {pipeline_mode = #tpu.pipeline_mode<synchronous>, transform_indices = @transform_1, window_bounds = array<i64: 1, 128>}, {pipeline_mode = #tpu.pipeline_mode<synchronous>, transform_indices = @transform_2, window_bounds = array<i64: 1, 128>}, {transform_indices = @transform_3, window_bounds = array<i64: 128, 128>}, {transform_indices = @transform_4, window_bounds = array<i64: 1, 128>}, {transform_indices = @transform_5, window_bounds = array<i64: 128, 128>}, {pipeline_mode = #tpu.pipeline_mode<synchronous>, transform_indices = @transform_6, window_bounds = array<i64: 1, 128>}, {transform_indices = @transform_7, window_bounds = array<i64: 16, 128>}]} {
    %c0_i32 = arith.constant 0 : i32
    %0 = arith.cmpi eq, %arg1, %c0_i32 : i32
    %1 = arith.extui %0 : i1 to i32
    %c0_i32_0 = arith.constant 0 : i32
    %2 = arith.cmpi ne, %1, %c0_i32_0 : i32
    scf.if %2 {
      %c0_17 = arith.constant 0 : index
      %c0_18 = arith.constant 0 : index
      %28 = vector.load %arg2[%c0_17, %c0_18] : memref<16x128xf32, #tpu.memory_space<vmem>>, vector<16x128xf32>
      %cst_19 = arith.constant dense<0.000000e+00> : vector<16xf32>
      %29 = vector.multi_reduction <add>, %28, %cst_19 [1] : vector<16x128xf32> to vector<16xf32>
      %30 = vector.shape_cast %29 : vector<16xf32> to vector<16x1xf32>
      %cst_20 = arith.constant 1.280000e+02 : f32
      %31 = vector.broadcast %cst_20 : f32 to vector<16x1xf32>
      %32 = arith.divf %30, %31 : vector<16x1xf32>
      %33 = vector.broadcast %32 : vector<16x1xf32> to vector<16x128xf32>
      %34 = arith.subf %28, %33 : vector<16x128xf32>
      %35 = arith.mulf %34, %34 : vector<16x128xf32>
      %cst_21 = arith.constant dense<0.000000e+00> : vector<16xf32>
      %36 = vector.multi_reduction <add>, %35, %cst_21 [1] : vector<16x128xf32> to vector<16xf32>
      %37 = vector.shape_cast %36 : vector<16xf32> to vector<16x1xf32>
      %cst_22 = arith.constant 1.280000e+02 : f32
      %38 = vector.broadcast %cst_22 : f32 to vector<16x1xf32>
      %39 = arith.divf %37, %38 : vector<16x1xf32>
      %cst_23 = arith.constant 9.99999974E-6 : f32
      %40 = vector.broadcast %cst_23 : f32 to vector<16x1xf32>
      %41 = arith.addf %39, %40 : vector<16x1xf32>
      %42 = math.rsqrt %41 : vector<16x1xf32>
      %43 = vector.broadcast %42 : vector<16x1xf32> to vector<16x128xf32>
      %44 = arith.mulf %34, %43 : vector<16x128xf32>
      %c0_24 = arith.constant 0 : index
      %c0_25 = arith.constant 0 : index
      %45 = vector.load %arg3[%c0_24, %c0_25] : memref<1x128xf32, #tpu.memory_space<vmem>>, vector<1x128xf32>
      %46 = vector.broadcast %45 : vector<1x128xf32> to vector<16x128xf32>
      %47 = arith.mulf %44, %46 : vector<16x128xf32>
      %c0_26 = arith.constant 0 : index
      %c0_27 = arith.constant 0 : index
      %48 = vector.load %arg4[%c0_26, %c0_27] : memref<1x128xf32, #tpu.memory_space<vmem>>, vector<1x128xf32>
      %49 = vector.broadcast %48 : vector<1x128xf32> to vector<16x128xf32>
      %50 = arith.addf %47, %49 : vector<16x128xf32>
      %c0_28 = arith.constant 0 : index
      %c0_29 = arith.constant 0 : index
      %51 = vector.load %arg10[%c0_28, %c0_29] : memref<16x128xf32, #tpu.memory_space<vmem>>, vector<16x128xf32>
      tpu.vector_store %arg10[%c0_28, %c0_29], %50 {strides = array<i32>} : memref<16x128xf32, #tpu.memory_space<vmem>>, vector<16x128xf32>,
    } else {
    }
    %c0 = arith.constant 0 : index
    %c0_1 = arith.constant 0 : index
    %3 = vector.load %arg10[%c0, %c0_1] : memref<16x128xf32, #tpu.memory_space<vmem>>, vector<16x128xf32>
    %c0_2 = arith.constant 0 : index
    %c0_3 = arith.constant 0 : index
    %4 = vector.load %arg5[%c0_2, %c0_3] : memref<128x128xf32, #tpu.memory_space<vmem>>, vector<128x128xf32>
    %cst = arith.constant dense<0.000000e+00> : vector<16x128xf32>
    %5 = tpu.matmul %3, %4, %cst {dimension_numbers = #tpu.dot_dimension_numbers<[1], [0], [0], [1], [0, 0, 1, 1], [], []>} : vector<16x128xf32>, vector<128x128xf32>, vector<16x128xf32> -> vector<16x128xf32>
    %c0_4 = arith.constant 0 : index
    %c0_5 = arith.constant 0 : index
    %6 = vector.load %arg6[%c0_4, %c0_5] : memref<1x128xf32, #tpu.memory_space<vmem>>, vector<1x128xf32>
    %7 = vector.broadcast %6 : vector<1x128xf32> to vector<16x128xf32>
    %8 = arith.addf %5, %7 : vector<16x128xf32>
    %cst_6 = arith.constant 5.000000e-01 : f32
    %9 = vector.broadcast %cst_6 : f32 to vector<16x128xf32>
    %10 = arith.mulf %9, %8 : vector<16x128xf32>
    %cst_7 = arith.constant 0.707106769 : f32
    %11 = vector.broadcast %cst_7 : f32 to vector<16x128xf32>
    %12 = arith.mulf %8, %11 : vector<16x128xf32>
    %13 = math.erf %12 : vector<16x128xf32>
    %cst_8 = arith.constant 1.000000e+00 : f32
    %14 = vector.broadcast %cst_8 : f32 to vector<16x128xf32>
    %15 = arith.addf %14, %13 : vector<16x128xf32>
    %16 = arith.mulf %10, %15 : vector<16x128xf32>
    %c0_9 = arith.constant 0 : index
    %c0_10 = arith.constant 0 : index
    %17 = vector.load %arg7[%c0_9, %c0_10] : memref<128x128xf32, #tpu.memory_space<vmem>>, vector<128x128xf32>
    %cst_11 = arith.constant dense<0.000000e+00> : vector<16x128xf32>
    %18 = tpu.matmul %16, %17, %cst_11 {dimension_numbers = #tpu.dot_dimension_numbers<[1], [0], [0], [1], [0, 0, 1, 1], [], []>} : vector<16x128xf32>, vector<128x128xf32>, vector<16x128xf32> -> vector<16x128xf32>
    %c0_i32_12 = arith.constant 0 : i32
    %19 = arith.cmpi eq, %arg1, %c0_i32_12 : i32
    %20 = arith.extui %19 : i1 to i32
    %c0_i32_13 = arith.constant 0 : i32
    %21 = arith.cmpi ne, %20, %c0_i32_13 : i32
    scf.if %21 {
      %c0_17 = arith.constant 0 : index
      %c0_18 = arith.constant 0 : index
      %28 = vector.load %arg11[%c0_17, %c0_18] : memref<16x128xf32, #tpu.memory_space<vmem>>, vector<16x128xf32>
      tpu.vector_store %arg11[%c0_17, %c0_18], %18 {strides = array<i32>} : memref<16x128xf32, #tpu.memory_space<vmem>>, vector<16x128xf32>,
    } else {
    }
    %c0_i32_14 = arith.constant 0 : i32
    %22 = arith.cmpi sgt, %arg1, %c0_i32_14 : i32
    %23 = arith.extui %22 : i1 to i32
    %c0_i32_15 = arith.constant 0 : i32
    %24 = arith.cmpi ne, %23, %c0_i32_15 : i32
    scf.if %24 {
      %c0_17 = arith.constant 0 : index
      %c0_18 = arith.constant 0 : index
      %28 = vector.load %arg11[%c0_17, %c0_18] : memref<16x128xf32, #tpu.memory_space<vmem>>, vector<16x128xf32>
      %29 = arith.addf %28, %18 : vector<16x128xf32>
      %c0_19 = arith.constant 0 : index
      %c0_20 = arith.constant 0 : index
      %30 = vector.load %arg11[%c0_19, %c0_20] : memref<16x128xf32, #tpu.memory_space<vmem>>, vector<16x128xf32>
      tpu.vector_store %arg11[%c0_19, %c0_20], %29 {strides = array<i32>} : memref<16x128xf32, #tpu.memory_space<vmem>>, vector<16x128xf32>,
    } else {
    }
    %c1_i32 = arith.constant 1 : i32
    %25 = arith.cmpi eq, %arg1, %c1_i32 : i32
    %26 = arith.extui %25 : i1 to i32
    %c0_i32_16 = arith.constant 0 : i32
    %27 = arith.cmpi ne, %26, %c0_i32_16 : i32
    scf.if %27 {
      %c0_17 = arith.constant 0 : index
      %c0_18 = arith.constant 0 : index
      %28 = vector.load %arg11[%c0_17, %c0_18] : memref<16x128xf32, #tpu.memory_space<vmem>>, vector<16x128xf32>
      %c0_19 = arith.constant 0 : index
      %c0_20 = arith.constant 0 : index
      %29 = vector.load %arg8[%c0_19, %c0_20] : memref<1x128xf32, #tpu.memory_space<vmem>>, vector<1x128xf32>
      %30 = vector.broadcast %29 : vector<1x128xf32> to vector<16x128xf32>
      %31 = arith.addf %28, %30 : vector<16x128xf32>
      %c0_21 = arith.constant 0 : index
      %c0_22 = arith.constant 0 : index
      %32 = vector.load %arg9[%c0_21, %c0_22] : memref<16x128xf32, #tpu.memory_space<vmem>>, vector<16x128xf32>
      tpu.vector_store %arg9[%c0_21, %c0_22], %31 {strides = array<i32>} : memref<16x128xf32, #tpu.memory_space<vmem>>, vector<16x128xf32>,
    } else {
    }
    return
  }
  func.func @transform_0(%arg0: i32, %arg1: i32) -> (i32, i32) {
    %c0_i32 = arith.constant 0 : i32
    %c0_i32_0 = arith.constant 0 : i32
    return %arg0, %c0_i32 : i32, i32
  }
  func.func @transform_1(%arg0: i32, %arg1: i32) -> (i32, i32) {
    %c0_i32 = arith.constant 0 : i32
    %c0_i32_0 = arith.constant 0 : i32
    %c0_i32_1 = arith.constant 0 : i32
    return %c0_i32, %c0_i32_0 : i32, i32
  }
  func.func @transform_2(%arg0: i32, %arg1: i32) -> (i32, i32) {
    %c0_i32 = arith.constant 0 : i32
    %c0_i32_0 = arith.constant 0 : i32
    %c0_i32_1 = arith.constant 0 : i32
    return %c0_i32, %c0_i32_0 : i32, i32
  }
  func.func @transform_3(%arg0: i32, %arg1: i32) -> (i32, i32) {
    %c0_i32 = arith.constant 0 : i32
    %c0_i32_0 = arith.constant 0 : i32
    return %c0_i32, %arg1 : i32, i32
  }
  func.func @transform_4(%arg0: i32, %arg1: i32) -> (i32, i32) {
    %c0_i32 = arith.constant 0 : i32
    %c0_i32_0 = arith.constant 0 : i32
    return %c0_i32, %arg1 : i32, i32
  }
  func.func @transform_5(%arg0: i32, %arg1: i32) -> (i32, i32) {
    %c0_i32 = arith.constant 0 : i32
    %c0_i32_0 = arith.constant 0 : i32
    return %arg1, %c0_i32 : i32, i32
  }
  func.func @transform_6(%arg0: i32, %arg1: i32) -> (i32, i32) {
    %c0_i32 = arith.constant 0 : i32
    %c0_i32_0 = arith.constant 0 : i32
    %c0_i32_1 = arith.constant 0 : i32
    return %c0_i32, %c0_i32_0 : i32, i32
  }
  func.func @transform_7(%arg0: i32, %arg1: i32) -> (i32, i32) {
    %c0_i32 = arith.constant 0 : i32
    %c0_i32_0 = arith.constant 0 : i32
    return %arg0, %c0_i32 : i32, i32
  }
}

</mosaic_0001>

<bundles_post_ra>
// kernel: tpu_custom_call.1
= control target key start
LH: loop header
LB: loop body
LE: loop exit
PB: predicated region body
PF: predicated region fallthrough
CT: control target
= control target key end

     0   :  { %s1588_s0 = inlined_call_operand.hbm [shape: f32[14,128], index: 0, kind: input, shape index: {}]   ;;  %s1589_s1 = inlined_call_operand.vmem [shape: f32[1,128], index: 1, kind: input, shape index: {}]   ;;  %s1590_s2 = inlined_call_operand.vmem [shape: f32[1,128], index: 2, kind: input, shape index: {}]   ;;  %s1591_s3 = inlined_call_operand.hbm [shape: f32[128,256], index: 3, kind: input, shape index: {}]   ;;  %s1592_s4 = inlined_call_operand.vmem [shape: f32[1,256], index: 4, kind: input, shape index: {}]   ;;  %s1593_s5 = inlined_call_operand.hbm [shape: f32[256,128], index: 5, kind: input, shape index: {}]   ;;  %s1594_s6 = inlined_call_operand.vmem [shape: f32[1,128], index: 6, kind: input, shape index: {}]   ;;  %s1595_s7 = inlined_call_operand.hbm [shape: f32[14,128], index: 7, kind: output, shape index: {}]  }
   0x1   :  { %1603 = sst [smem:[#allocation14_spill]] %s1591_s3 }
   0x2   :  { %1604 = sst [smem:[#allocation15_spill]] %s1593_s5 }
   0x3   :  { %12 = vsyncpa [#allocation5], 0 }
   0x4   :  { %13 = vsyncpa [#allocation8], 0 }
   0x5   :  { %15 = vsyncpa [#allocation8 + $0x1], 0 }
   0x6   :  { %16 = vsyncpa [#allocation6], 0  ;;  %s1286_s24 = smov 0   ;;  %s1288_s25 = smov 0  }
   0x7   :  { %s1290_s26 = smov 0   ;;  %s1292_s27 = smov 0  }
   0x8   :  { %s1294_s28 = smov 0   ;;  %s1296_s29 = smov 0  }
   0x9 LB: > { %s31_s30 = sadd.s32 1, %s1231_s28  ;;  %s109_s8 = sadd.s32 1, %s1223_s26  ;;  %s1235_s29 = sphi %s1296_s29, %s22_s29   ;;  %s1231_s28 = sphi %s1294_s28, %s1622_s28   ;;  %s1227_s27 = sphi %s1292_s27, %s1621_s27   ;;  %s1223_s26 = sphi %s1290_s26, %s1620_s26   ;;  %s1219_s25 = sphi %s1288_s25, %s1619_s25   ;;  %s1215_s24 = sphi %s1286_s24, %s1618_s24  }
   0xa   : > { %p32_p0 = scmp.ge.s32.totalorder %s31_s30, 2  ;;  %p116_p1 = scmp.ne.s32.totalorder %s1223_s26, %s1219_s25 }
   0xb   : > { %p117_p2 = scmp.eq.s32.totalorder %s1235_s29, 0  ;;  %p996_p5 = scmp.lt.s32.totalorder %s1235_s29, 2 }
   0xc   : > { %s1624_s30 = smov (%p32_p0, %s31_s30), 0  ;;  %s270_s11 = sand.u32 1, %s1235_s29  }
   0xd   : > { %p1323_p3 = por %p117_p2, %p116_p1  ;;  %s106_s10 = ssub.s32 %s1231_s28, %s1624_s30 }
   0xe   : > { %p107_p4 = scmp.eq.s32.totalorder %s106_s10, 0  ;;  %s272_s12 = sand.u32 1, %s1223_s26  }
   0xf   : > { %s1335_s14 = sshll.u32 %s272_s12, 7  ;;  %s781_s15 = sshll.u32 %s1231_s28, 7 }
  0x10   : > { %s1333_s13 = scalar_select %p107_p4, %s1223_s26, %s109_s8  }
  0x11   : > { %s1606_s3 = sld [smem:[#allocation14_spill]]  ;;  %s274_s19 = scalar_lea.vmem [#allocation7], %s1335_s14 }
  0x12   : > { %s280_s20 = sshll.u32 %s274_s19, 4  ;;  %p1348_p6 = pnand %p996_p5, %p1323_p3  ;;  %s1344_s20 = int_to_ptr.vmem [resolvable:$true] %s280_s20 }
  0x13   : > { %s1352_s22 = scalar_lea.sflag [#allocation8], %s270_s11 }
  0x14   : > { %p1065_p8 = pneg %p1348_p6 }
  0x17   : > { %s1341_s18 = scalar_lea.hbm %s1606_s3, %s781_s15  ;;  %s1068_s9 = scalar_lea.hbm %s1606_s3, 4096 }
  0x18   : > { %s1063_s23 = scalar_lea.hbm %s1341_s18, 2048  ;;  %p1069_p11 = scmp.lt.u32.totalorder %s1341_s18, %s1606_s3 }
  0x19   : > { %p1064_p7 = scmp.ne.s32.totalorder %s1341_s18, %s1063_s23  ;;  %p1070_p12 = scmp.lt.u32.totalorder %s1068_s9, %s1063_s23 }
  0x1a   : > { %p1072_p0 = scmp.lt.u32.totalorder %s1063_s23, %s1341_s18 }
  0x1b   : > { %p1066_p9 = pnand %p1065_p8, %p1064_p7  ;;  %p1071_p13 = por %p1070_p12, %p1069_p11 }
  0x1d   : > { %p1067_p10 = pneg %p1066_p9  ;;  %p1073_p1 = por %p1072_p0, %p1071_p13 }
  0x1f   : > { %p1074_p2 = pnand %p1073_p1, %p1067_p10 }
  0x21   : > { %1077 = shalt.err (!%p1074_p2)
}
  0x22   : > { %s1078_s11 = scalar_lea.vmem %s1344_s20, 2048  ;;  %s1237_s16 = smov [#allocation7]  }
  0x23   : > { %p1079_p3 = scmp.ne.s32.totalorder %s1344_s20, %s1078_s11  ;;  %s1083_s17 = sshll.u32 %s1237_s16, 4  ;;  %s1084_s17 = int_to_ptr.vmem [resolvable:$false] %s1083_s17 }
  0x24   : > { %s1085_s19 = scalar_lea.vmem %s1084_s17, 4096  ;;  %p1086_p7 = scmp.lt.s32.totalorder %s1344_s20, %s1084_s17 }
  0x25   : > { %p1081_p4 = pnand %p1079_p3, %p1065_p8  ;;  %p1087_p9 = scmp.lt.s32.totalorder %s1085_s19, %s1078_s11 }
  0x27   : > { %p1082_p5 = pneg %p1081_p4  ;;  %p1088_p11 = por %p1087_p9, %p1086_p7 }
  0x29   : > { %p1089_p12 = pnand %p1088_p11, %p1082_p5 }
  0x2b   : > { %1092 = shalt.err (!%p1089_p12)
}
  0x2c   : > { %s1238_s23 = smov 256   ;;  %s1596_s8 = smov 128  }
  0x2d   : > { %s1598_s10 = smov 8   ;;  %s1383_s9 = sadd.s32 4294967295, %s1235_s29  }
  0x2e   : > { %991 = dma.hbm_to_vmem [thread:$0]  (!%p1348_p6), %s1341_s18, 2048, %s1344_s20, %s1352_s22, %s1238_s23, %s1596_s8, %s1598_s10  }
  0x2f   : > { %p122_p10 = scmp.ne.s32.totalorder %s1219_s25, %s1215_s24  ;;  %p1600_p13 = scmp.eq.s32.totalorder %s1383_s9, 0 }
  0x30   : > { %p777_p0 = scmp.ge.s32.totalorder %s1235_s29, 1  ;;  %p232_p1 = scmp.lt.s32.totalorder %s1235_s29, 3 }
  0x31   : > { %p1392_p2 = por %p1600_p13, %p122_p10  ;;  %s1241_s18 = smov [#allocation4]  }
  0x32   : > { %p1396_p3 = pnand %p777_p0, %p232_p1  ;;  %s247_s20 = sshll.u32 %s1241_s18, 4  ;;  %s1400_s20 = int_to_ptr.vmem [resolvable:$true] %s247_s20 }
  0x33   : > { %s1608_s12 = scalar_select %p1392_p2, 1, 0 }
  0x34   : > { %s1609_s15 = scalar_select %p1396_p3, 1, 0 }
  0x35   : > { %p984_p4 = pneg %p1396_p3  ;;  %s801_s24 = sshll.u32 %s1231_s28, 11 }
  0x36   : > { %s1610_s5 = sld [smem:[#allocation15_spill]]  ;;  %s300_s19 = scalar_lea.vmem [#allocation9], %s1335_s14 }
  0x37   : > { %s307_s23 = sshll.u32 %s300_s19, 4  ;;  %p1413_p5 = pnand %p984_p4, %p1600_p13  ;;  %s1417_s23 = int_to_ptr.vmem [resolvable:$true] %s307_s23 }
  0x3c   : > { %s1408_s17 = scalar_lea.hbm %s1610_s5, %s801_s24  ;;  %s1098_s16 = scalar_lea.hbm %s1610_s5, 4096 }
  0x3d   : > { %s1093_s18 = scalar_lea.hbm %s1408_s17, 2048  ;;  %p1099_p12 = scmp.lt.u32.totalorder %s1408_s17, %s1610_s5 }
  0x3e   : > { %p1094_p7 = scmp.ne.s32.totalorder %s1408_s17, %s1093_s18  ;;  %p1100_p10 = scmp.lt.u32.totalorder %s1098_s16, %s1093_s18 }
  0x3f   : > { %p1102_p1 = scmp.lt.u32.totalorder %s1093_s18, %s1408_s17 }
  0x40   : > { %p1096_p9 = pnand %p1094_p7, %p1065_p8  ;;  %p1101_p0 = por %p1100_p10, %p1099_p12 }
  0x42   : > { %p1097_p11 = pneg %p1096_p9  ;;  %p1103_p4 = por %p1102_p1, %p1101_p0 }
  0x44   : > { %p1104_p13 = pnand %p1103_p4, %p1097_p11 }
  0x46   : > { %1107 = shalt.err (!%p1104_p13)
}
  0x47   : > { %s1108_s19 = scalar_lea.vmem %s1417_s23, 2048  ;;  %s1242_s24 = smov [#allocation9]  }
  0x48   : > { %p1109_p7 = scmp.ne.s32.totalorder %s1417_s23, %s1108_s19  ;;  %s1113_s11 = sshll.u32 %s1242_s24, 4  ;;  %s1114_s11 = int_to_ptr.vmem [resolvable:$false] %s1113_s11 }
  0x49   : > { %s1115_s10 = scalar_lea.vmem %s1114_s11, 4096  ;;  %p1116_p3 = scmp.lt.s32.totalorder %s1417_s23, %s1114_s11 }
  0x4a   : > { %p1111_p9 = pnand %p1109_p7, %p1065_p8  ;;  %p1117_p12 = scmp.lt.s32.totalorder %s1115_s10, %s1108_s19 }
  0x4c   : > { %p1112_p2 = pneg %p1111_p9  ;;  %p1118_p10 = por %p1117_p12, %p1116_p3 }
  0x4e   : > { %p1119_p0 = pnand %p1118_p10, %p1112_p2 }
  0x50   : > { %1122 = shalt.err (!%p1119_p0)
}
  0x51   : > { %s1612_s18 = smov 8   ;;  %s1613_s16 = smov 128  }
  0x52   : > { %994 = dma.hbm_to_vmem [thread:$0]  (!%p1348_p6), %s1408_s17, 2048, %s1417_s23, %s1352_s22, %s1613_s16, %s1613_s16, %s1612_s18  }
  0x53   : > { %s1123_s24 = scalar_lea.hbm %s1588_s0, 256  ;;  %p1125_p13 = pneg %p1413_p5 }
  0x54   : > { %p1124_p8 = scmp.ne.s32.totalorder %s1588_s0, %s1123_s24  ;;  %p1130_p11 = scmp.lt.u32.totalorder %s1123_s24, %s1588_s0 }
  0x56   : > { %p1126_p2 = pnand %p1125_p13, %p1124_p8 }
  0x58   : > { %p1127_p3 = pneg %p1126_p2 }
  0x5a   : > { %p1132_p1 = pnand %p1130_p11, %p1127_p3 }
  0x5c   : > { %1135 = shalt.err (!%p1132_p1)
}
  0x5d   : > { %s1136_s22 = scalar_lea.vmem %s1400_s20, 256  ;;  %p1144_p9 = scmp.lt.s32.totalorder %s1400_s20, %s1400_s20 }
  0x5e   : > { %p1137_p6 = scmp.ne.s32.totalorder %s1400_s20, %s1136_s22  ;;  %p1145_p12 = scmp.lt.s32.totalorder %s1136_s22, %s1136_s22 }
  0x60   : > { %p1139_p4 = pnand %p1137_p6, %p1125_p13  ;;  %p1146_p10 = por %p1145_p12, %p1144_p9 }
  0x62   : > { %p1140_p7 = pneg %p1139_p4 }
  0x64   : > { %p1147_p0 = pnand %p1146_p10, %p1140_p7 }
  0x66   : > { %1150 = shalt.err (!%p1147_p0)
}
  0x67   : > { %987 = dma.hbm_to_vmem [thread:$0]  (!%p1413_p5), %s1588_s0, 256, %s1400_s20, [#allocation5], %s1613_s16, %s1613_s16, %s1612_s18  }
  0x68   : > { %p1614_p8 = scmp.ne.s32.totalorder %s1609_s15, 0 }
  0x69   : > { %p1615_p13 = scmp.eq.s32.totalorder (!%p1614_p8), %s1383_s9, 0 }
  0x6a   : > { %319 = sbr.rel (%p1614_p8) target bundleno = 967 (0x3c7), region = 48 }
  0x71   : > { %1202 = dma.done.wait (%p1615_p13), [#allocation5], 256   ;;  %p1616_p2 = pmov %p1615_p13 }
  0x72   : > { %s325_s8 = sand.u32 1, %s1383_s9   ;;  %s327_s17 = sand.u32 1, %s1219_s25  }
  0x73   : > { %1204 = vsyncadd (%p1616_p2), [#allocation5], 4294967040  ;;  %s787_s23 = sshll.u32 %s327_s17, 7  ;;  %s326_s10 = scalar_lea.sflag [#allocation8], %s325_s8 }
  0x74   : > { %s1478_s14 = scalar_lea.vmem [#allocation7], %s787_s23  ;;  %p1617_p3 = scmp.ne.s32.totalorder %s1608_s12, 0 }
  0x76   : > { %1206 = dma.done.wait (%p1617_p3), %s326_s10, 4096  }
  0x77   : > { %1208 = vsyncadd (%p1617_p3), %s326_s10, 4294963200  ;;  %p373_p5 = scmp.lt.s32.totalorder %s1227_s27, 1  ;;  %s1492_s24 = scalar_lea.vmem [#allocation9], %s787_s23 }
  0x78   : > { %p789_p11 = scmp.ne.s32.totalorder %s1227_s27, 0 }
  0x79   : > { %s1486_s15 = scalar_select %p373_p5, %s1227_s27, 1 }
  0x7a   : > { %381 = sbr.rel (%p789_p11) target bundleno = 439 (0x1b7), region = 64  ;;  %v382_v0 = vld [vmem:[#allocation4] sm:$0xff] (!%p789_p11)  ;;  %v383_v1 = vld [vmem:[#allocation4 + $0x8] sm:$0xff] (!%p789_p11) }
  0x7b   : > { %s375_s16 = scalar_lea.vmem %s1592_s4, %s1486_s15  ;;  %384 = vadd.xlane.f32.xlu0 (!%p789_p11), %v382_v0  ;;  %v790_v17 = vld [vmem:[%s1589_s1] ss:$0 sm:$0xff] (!%p789_p11) }
  0x7c   : > { %v791_v19 = vld [vmem:[%s1590_s2] ss:$0 sm:$0xff] (!%p789_p11) }
  0x7f   : > { %386 = vadd.xlane.f32.xlu0 (!%p789_p11), %v383_v1 }
 0x108   : > { %v385_v2 = vpop.xlane.xlu0 %384 }
 0x109   : > { %v389_v3 = vmul.f32 0.0078125, %v385_v2 }
 0x10b   : > { %v391_v4 = vsub.f32 %v382_v0, %v389_v3 }
 0x10c   : > { %v387_v5 = vpop.xlane.xlu0 %386 }
 0x10d   : > { %v390_v6 = vmul.f32 0.0078125, %v387_v5  ;;  %v393_v7 = vmul.f32 %v391_v4, %v391_v4 }
 0x10f   : > { %v392_v8 = vsub.f32 %v383_v1, %v390_v6  ;;  %395 = vadd.xlane.f32.xlu1 %v393_v7 }
 0x111   : > { %v394_v9 = vmul.f32 %v392_v8, %v392_v8 }
 0x113   : > { %397 = vadd.xlane.f32.xlu1 %v394_v9 }
 0x19c   : > { %v396_v10 = vpop.xlane.xlu1 %395 }
 0x19d   : > { %v399_v11 = vmul.f32 0.0078125, %v396_v10 }
 0x19f   : > { %v401_v12 = vadd.f32 1e-05, %v399_v11 }
 0x1a0   : > { %v398_v13 = vpop.xlane.xlu1 %397 }
 0x1a1   : > { %1055 = vrsqrt.f32 %v401_v12  ;;  %v400_v14 = vmul.f32 0.0078125, %v398_v13 }
 0x1a3   : > { %v402_v15 = vadd.f32 1e-05, %v400_v14 }
 0x1a5   : > { %1057 = vrsqrt.f32 %v402_v15 }
 0x1ab   : > { %v1056_v16 = vpop.eup %1055 }
 0x1ac   : > { %v405_v18 = vmul.f32 %v1056_v16, %v391_v4 }
 0x1ae   : > { %v414_v20 = vmul.f32 %v790_v17, %v405_v18 }
 0x1af   : > { %v1058_v21 = vpop.eup %1057 }
 0x1b0   : > { %v423_v22 = vadd.f32 %v791_v19, %v414_v20  ;;  %v406_v23 = vmul.f32 %v1058_v21, %v392_v8 }
 0x1b2   : > { %425 = vst [vmem:[#allocation2] sm:$0xff] %v423_v22  ;;  %v415_v24 = vmul.f32 %v790_v17, %v406_v23 }
 0x1b4   : > { %v424_v25 = vadd.f32 %v791_v19, %v415_v24 }
 0x1b6   : > { %426 = vst [vmem:[#allocation2 + $0x8] sm:$0xff] %v424_v25 }
 0x1b7 PF: > { %v429_v26 = vld [vmem:[%s1478_s14] sm:$0xff]  ;;  %v430_v27 = vld [vmem:[%s1478_s14 + $0x8] sm:$0xff]  ;;  %v431_v28 = vld [vmem:[%s1478_s14 + $0x10] sm:$0xff] }
 0x1b8   : > { %v908_v29 = vpack.c.bf16 %v430_v27, %v429_v26  ;;  %v432_v30 = vld [vmem:[%s1478_s14 + $0x18] sm:$0xff]  ;;  %v433_v32 = vld [vmem:[%s1478_s14 + $0x20] sm:$0xff]  ;;  %v434_v33 = vld [vmem:[%s1478_s14 + $0x28] sm:$0xff] }
 0x1b9   : > { %v912_v31 = vpack.c.bf16 %v432_v30, %v431_v28  ;;  %v916_v34 = vpack.c.bf16 %v434_v33, %v433_v32  ;;  %v435_v35 = vld [vmem:[%s1478_s14 + $0x30] sm:$0xff]  ;;  %v436_v36 = vld [vmem:[%s1478_s14 + $0x38] sm:$0xff]  ;;  %v537_v38 = vld [vmem:[%s1492_s24] sm:$0xff] }
 0x1ba   : > { %909 = vmatprep.subr.bf16.mxu0 %v908_v29  ;;  %v427_v37 = vld [vmem:[#allocation2] sm:$0xff]  ;;  %v538_v39 = vld [vmem:[%s1492_s24 + $0x8] sm:$0xff]  ;;  %v540_v42 = vld [vmem:[%s1492_s24 + $0x18] sm:$0xff]  ;;  %v920_v46 = vpack.c.bf16 %v436_v36, %v435_v35 }
 0x1bb   : > { %911 = vmatpush3.bf16.msra.mxu0 %v908_v29  ;;  %870 = vmatprep.mubr.f32.mxu0 %v427_v37  ;;  %v539_v40 = vld [vmem:[%s1492_s24 + $0x10] sm:$0xff]  ;;  %v940_v41 = vpack.c.bf16 %v538_v39, %v537_v38  ;;  %v541_v44 = vld [vmem:[%s1492_s24 + $0x20] sm:$0xff]  ;;  %v542_v45 = vld [vmem:[%s1492_s24 + $0x28] sm:$0xff] }
 0x1bc   : > { %913 = vmatprep.subr.bf16.mxu0 %v912_v31  ;;  %v944_v43 = vpack.c.bf16 %v540_v42, %v539_v40  ;;  %v437_v47 = vld [vmem:[%s1478_s14 + $0x40] sm:$0xff]  ;;  %v438_v48 = vld [vmem:[%s1478_s14 + $0x48] sm:$0xff]  ;;  %v948_v49 = vpack.c.bf16 %v542_v45, %v541_v44  ;;  %v439_v51 = vld [vmem:[%s1478_s14 + $0x50] sm:$0xff] }
 0x1bd   : > { %941 = vmatprep.subr.bf16.mxu1 %v940_v41  ;;  %v924_v50 = vpack.c.bf16 %v438_v48, %v437_v47  ;;  %v440_v52 = vld [vmem:[%s1478_s14 + $0x58] sm:$0xff]  ;;  %v441_v54 = vld [vmem:[%s1478_s14 + $0x60] sm:$0xff]  ;;  %v442_v55 = vld [vmem:[%s1478_s14 + $0x68] sm:$0xff] }
 0x1be   : > { %943 = vmatpush3.bf16.msra.mxu1 %v940_v41  ;;  %v928_v53 = vpack.c.bf16 %v440_v52, %v439_v51  ;;  %v932_v56 = vpack.c.bf16 %v442_v55, %v441_v54  ;;  %v443_v57 = vld [vmem:[%s1478_s14 + $0x70] sm:$0xff]  ;;  %v444_v58 = vld [vmem:[%s1478_s14 + $0x78] sm:$0xff]  ;;  %v545_v0 = vld [vmem:[%s1492_s24 + $0x40] sm:$0xff] }
 0x1bf   : > { %915 = vmatpush3.bf16.msra.mxu0 %v912_v31  ;;  %945 = vmatprep.subr.bf16.mxu1 %v944_v43  ;;  %v936_v59 = vpack.c.bf16 %v444_v58, %v443_v57  ;;  %v428_v60 = vld [vmem:[#allocation2 + $0x8] sm:$0xff]  ;;  %v543_v61 = vld [vmem:[%s1492_s24 + $0x30] sm:$0xff]  ;;  %v546_v1 = vld [vmem:[%s1492_s24 + $0x48] sm:$0xff] }
 0x1c0   : > { %917 = vmatprep.subr.bf16.mxu0 %v916_v34  ;;  %v544_v62 = vld [vmem:[%s1492_s24 + $0x38] sm:$0xff]  ;;  %v956_v2 = vpack.c.bf16 %v546_v1, %v545_v0  ;;  %v547_v3 = vld [vmem:[%s1492_s24 + $0x50] sm:$0xff]  ;;  %v549_v6 = vld [vmem:[%s1492_s24 + $0x60] sm:$0xff] }
 0x1c1   : > { %v952_v63 = vpack.c.bf16 %v544_v62, %v543_v61  ;;  %v548_v4 = vld [vmem:[%s1492_s24 + $0x58] sm:$0xff]  ;;  %v550_v7 = vld [vmem:[%s1492_s24 + $0x68] sm:$0xff]  ;;  %v551_v9 = vld [vmem:[%s1492_s24 + $0x70] sm:$0xff] }
 0x1c2   : > { %947 = vmatpush3.bf16.msra.mxu1 %v944_v43  ;;  %v960_v5 = vpack.c.bf16 %v548_v4, %v547_v3  ;;  %v964_v8 = vpack.c.bf16 %v550_v7, %v549_v6  ;;  %v552_v10 = vld [vmem:[%s1492_s24 + $0x78] sm:$0xff]  ;;  %v792_v12 = vld [vmem:[%s375_s16] ss:$0 sm:$0xff] }
 0x1c3   : > { %919 = vmatpush3.bf16.msra.mxu0 %v916_v34  ;;  %949 = vmatprep.subr.bf16.mxu1 %v948_v49  ;;  %v968_v11 = vpack.c.bf16 %v552_v10, %v551_v9 }
 0x1c4   : > { %921 = vmatprep.subr.bf16.mxu0 %v920_v46 }
 0x1c6   : > { %951 = vmatpush3.bf16.msra.mxu1 %v948_v49 }
 0x1c7   : > { %923 = vmatpush3.bf16.msra.mxu0 %v920_v46  ;;  %953 = vmatprep.subr.bf16.mxu1 %v952_v63 }
 0x1c8   : > { %925 = vmatprep.subr.bf16.mxu0 %v924_v50 }
 0x1ca   : > { %955 = vmatpush3.bf16.msra.mxu1 %v952_v63 }
 0x1cb   : > { %927 = vmatpush3.bf16.msra.mxu0 %v924_v50  ;;  %957 = vmatprep.subr.bf16.mxu1 %v956_v2 }
 0x1cc   : > { %929 = vmatprep.subr.bf16.mxu0 %v928_v53 }
 0x1ce   : > { %959 = vmatpush3.bf16.msra.mxu1 %v956_v2 }
 0x1cf   : > { %931 = vmatpush3.bf16.msra.mxu0 %v928_v53  ;;  %961 = vmatprep.subr.bf16.mxu1 %v960_v5 }
 0x1d0   : > { %933 = vmatprep.subr.bf16.mxu0 %v932_v56 }
 0x1d2   : > { %963 = vmatpush3.bf16.msra.mxu1 %v960_v5 }
 0x1d3   : > { %935 = vmatpush3.bf16.msra.mxu0 %v932_v56  ;;  %965 = vmatprep.subr.bf16.mxu1 %v964_v8 }
 0x1d4   : > { %937 = vmatprep.subr.bf16.mxu0 %v936_v59 }
 0x1d6   : > { %967 = vmatpush3.bf16.msra.mxu1 %v964_v8 }
 0x1d7   : > { %939 = vmatpush3.bf16.msra.mxu0 %v936_v59  ;;  %969 = vmatprep.subr.bf16.mxu1 %v968_v11 }
 0x1da   : > { %871 = vmatmul.mubr.f32.vlgmr.msra.gmra.mrb[0].mxu0 %v428_v60  ;;  %971 = vmatpush3.bf16.msra.mxu1 %v968_v11 }
 0x2ad   : > { %v872_v13 = vpop.f32.mrb[0].mxu0 }
 0x2ae   : > { %v524_v14 = vadd.f32 %v872_v13, %v792_v12  ;;  %v518_v15 = vpop.f32.mrb[1].mxu0 }
 0x2af   : > { %v519_v16 = vadd.f32 %v792_v12, %v518_v15 }
 0x2b0   : > { %v530_v17 = vmul.f32 0.70710677, %v524_v14  ;;  %v528_v24 = vmul.f32 0.5, %v524_v14 }
 0x2b1   : > { %v529_v18 = vmul.f32 0.70710677, %v519_v16  ;;  %v527_v22 = vmul.f32 0.5, %v519_v16 }
 0x2b2   : > { %1059 = verf.f32 %v530_v17 }
 0x2b3   : > { %1061 = verf.f32 %v529_v18 }
 0x2bc   : > { %v1060_v19 = vpop.eup %1059 }
 0x2bd   : > { %v1062_v20 = vpop.eup %1061  ;;  %v534_v21 = vadd.f32 1.0, %v1060_v19 }
 0x2be   : > { %v533_v23 = vadd.f32 1.0, %v1062_v20 }
 0x2bf   : > { %v536_v26 = vmul.f32 %v534_v21, %v528_v24 }
 0x2c0   : > { %v535_v25 = vmul.f32 %v533_v23, %v527_v22 }
 0x2c2   : > { %905 = vmatprep.mubr.f32.mxu1 %v535_v25 }
 0x2c3   : > { %906 = vmatmul.mubr.f32.vlgmr.msra.gmra.mrb[0].mxu1 %v536_v26 }
 0x391   : > { %630 = sbr.rel (%p789_p11) target bundleno = 921 (0x399), region = 68 }
 0x396   : > { %v907_v27 = vpop.f32.mrb[0].mxu1 }
 0x397   : > { %v619_v28 = vpop.f32.mrb[1].mxu1  ;;  %632 = vst [vmem:[#allocation3 + $0x8] sm:$0xff] (!%p789_p11), %v907_v27 }
 0x398   : > { %631 = vst [vmem:[#allocation3] sm:$0xff] %v619_v28 }
 0x399 PF: > { %p794_p1 = scmp.le.s32.totalorder %s1227_s27, 0 }
 0x39b   : > { %636 = sbr.rel (%p794_p1) target bundleno = 931 (0x3a3), region = 72 }
 0x39f   : > { %v637_v29 = vld [vmem:[#allocation3] sm:$0xff] (!%p794_p1)  ;;  %v638_v30 = vld [vmem:[#allocation3 + $0x8] sm:$0xff] (!%p794_p1) }
 0x3a0   : > { %v639_v31 = vadd.f32 (!%p794_p1), %v637_v29, %v619_v28  ;;  %v640_v32 = vadd.f32 (!%p794_p1), %v907_v27, %v638_v30 }
 0x3a2   : > { %641 = vst [vmem:[#allocation3] sm:$0xff] %v639_v31  ;;  %642 = vst [vmem:[#allocation3 + $0x8] sm:$0xff] %v640_v32 }
 0x3a3 PF: > { %p795_p6 = scmp.ne.s32.totalorder %s1227_s27, 1 }
 0x3a4   : > { %v796_v34 = vld [vmem:[%s1594_s6] ss:$0 sm:$0xff] (!%p795_p6) }
 0x3a5   : > { %646 = sbr.rel (%p795_p6) target bundleno = 941 (0x3ad), region = 76 }
 0x3a9   : > { %v647_v33 = vld [vmem:[#allocation3] sm:$0xff] (!%p795_p6)  ;;  %v648_v35 = vld [vmem:[#allocation3 + $0x8] sm:$0xff] (!%p795_p6) }
 0x3aa   : > { %v656_v36 = vadd.f32 (!%p795_p6), %v796_v34, %v647_v33  ;;  %v657_v37 = vadd.f32 (!%p795_p6), %v796_v34, %v648_v35 }
 0x3ac   : > { %658 = vst [vmem:[#allocation10] sm:$0xff] %v656_v36  ;;  %659 = vst [vmem:[#allocation10 + $0x8] sm:$0xff] %v657_v37 }
 0x3ad PF: > { %p998_p4 = scmp.eq.s32.totalorder %s1383_s9, 1  ;;  %s1243_s17 = smov [#allocation10]  }
 0x3ae   : > { %s669_s23 = sshll.u32 %s1243_s17, 4  ;;  %s670_s23 = int_to_ptr.vmem [resolvable:$true] %s669_s23 }
 0x3af   : > { %s1151_s10 = scalar_lea.vmem %s670_s23, 256  ;;  %p1158_p10 = scmp.lt.s32.totalorder %s670_s23, %s670_s23 }
 0x3b0   : > { %p1152_p7 = scmp.ne.s32.totalorder %s670_s23, %s1151_s10  ;;  %p1159_p0 = scmp.lt.s32.totalorder %s1151_s10, %s1151_s10 }
 0x3b2   : > { %p1153_p9 = pnand %p1152_p7, %p998_p4  ;;  %p1160_p8 = por %p1159_p0, %p1158_p10 }
 0x3b4   : > { %p1154_p12 = pneg %p1153_p9 }
 0x3b6   : > { %p1161_p13 = pnand %p1160_p8, %p1154_p12 }
 0x3b8   : > { %1164 = shalt.err (!%p1161_p13)
}
 0x3b9   : > { %s1165_s15 = scalar_lea.hbm %s1595_s7, 256 }
 0x3ba   : > { %p1166_p2 = scmp.ne.s32.totalorder %s1595_s7, %s1165_s15  ;;  %p1171_p11 = scmp.lt.u32.totalorder %s1165_s15, %s1595_s7 }
 0x3bc   : > { %p1167_p3 = pnand %p1166_p2, %p998_p4 }
 0x3be   : > { %p1168_p5 = pneg %p1167_p3 }
 0x3c0   : > { %p1173_p1 = pnand %p1171_p11, %p1168_p5 }
 0x3c2   : > { %1176 = shalt.err (!%p1173_p1)
}
 0x3c3   : > { %s1244_s12 = smov 128   ;;  %s1245_s11 = smov 8  }
 0x3c4   : > { %981 = dma.vmem_to_hbm [thread:$0]  (%p998_p4), %s670_s23, 256, %s1595_s7, [#allocation6], %s1244_s12, %s1244_s12, %s1245_s11  }
 0x3c5   : > { %1210 = dma.done.wait (%p998_p4), [#allocation6], 256  }
 0x3c6   : > { %1212 = vsyncadd (%p998_p4), [#allocation6], 4294967040 }
 0x3c7 PF: > { %s22_s29 = sadd.s32 1, %s1235_s29   ;;  %s1618_s24 = smov %s1219_s25 }
 0x3c8   : > { %p19_p6 = scmp.ge.s32.totalorder %s22_s29, 4   ;;  %s1619_s25 = smov %s1223_s26 }
 0x3c9   : > { %s1620_s26 = smov %s1333_s13  ;;  %s1621_s27 = smov %s1231_s28 }
 0x3ca   : > { %s1622_s28 = smov %s1624_s30  ;;  %21 = sbr.rel (!%p19_p6) target bundleno = 9 (0x9), region = 122 }
 0x3d1   :  { %685 = vsyncpa [#allocation5], 1 }
 0x3d2   :  { %687 = vsyncpa [#allocation5 + $0x1], 1 }
 0x3d3   :  { %688 = vsyncpa [#allocation8], 1 }
 0x3d4   :  { %690 = vsyncpa [#allocation8 + $0x1], 1 }
 0x3d5   :  { %691 = vsyncpa [#allocation6], 1 }
 0x3d6   :  { %693 = vsyncpa [#allocation6 + $0x1], 1 }

</bundles_post_ra>
